<compile_context>
chip_gen: v7x
topology: tpu7x:2x2x1
jax: 0.10.0
libtpu: 0.0.40
codegen_flags: <defaults>
</compile_context>

<pallas_src>
import math

import jax
import jax.numpy as jnp
from jax.experimental import pallas as pl
from jax.experimental.pallas import tpu as pltpu

D_IN, H1, H2, D_OUT = 17, 32, 16, 5
EPS = 1e-12  # F.normalize default eps

# Padded-layout VMEM cost per (batch, seq) row, in bytes:
#   x input tile (17 lanes -> 128): 512 B/row, double-buffered        ~1024 B
#   xn / x*x temporaries                                              ~1024 B
#   per-(b,f) norm temporaries (bt,1,17): <= 4096/S_pad per row       <=512 B
#   feature-major h1/h2/h3/softmax temps ((32+16+8+8) sublanes * 4 B)  ~300 B
#   output tile (5->8 sublanes, rows lanes), double-buffered            ~64 B
# plus compiler-internal scratch -> budget 4 KiB per row.
_VMEM_BYTES_PER_ROW = 4096


def fcnn_kernel(alpha_ref,               # (3,) SMEM: PReLU params
                x_ref,                   # (bt, S_pad, D_IN) VMEM
                w1t_ref, b1_ref,         # (H1, D_IN), (H1, 1)
                w2t_ref, b2_ref,         # (H2, H1),  (H2, 1)
                w3t_ref, b3_ref,         # (D_OUT, H2), (D_OUT, 1)
                o_ref):                  # (D_OUT, bt * S_pad) VMEM
    bt, s, _ = x_ref.shape
    m = bt * s

    x = x_ref[...]                                            # (bt, S, 17)

    # F.normalize(p=2, dim=1): L2 norm along the seq axis per (batch, feature),
    # computed on the 3-D view so norms never mix across batch items.  The
    # divide happens once on the reduced (bt, 1, 17) tensor, then is applied
    # as a broadcast multiply (reciprocal-then-multiply).
    sq = jnp.sum(x * x, axis=1, keepdims=True)                # (bt, 1, 17)
    inv_norm = 1.0 / jnp.maximum(jnp.sqrt(sq), EPS)           # exact reciprocal
    xn = x * inv_norm                                         # (bt, S, 17)

    # Free re-tiling: the wrapper guarantees S_pad % 8 == 0.
    xn2d = xn.reshape(m, D_IN)                                # (M, 17)

    a1 = alpha_ref[0]
    a2 = alpha_ref[1]
    a3 = alpha_ref[2]

    # ---- Feature-major chain: activations are (features, rows) with rows on
    # ---- the lane axis, so every elementwise pass is lane-dense.
    # h1^T = W1^T @ xn^T, expressed as a dot_general contracting the two
    # feature axes (same MXU pattern as q @ k^T) -> no explicit transpose.
    h = jax.lax.dot_general(
        w1t_ref[...], xn2d, (((1,), (1,)), ((), ())),
        preferred_element_type=jnp.float32)                   # (H1, M)
    h = h + b1_ref[...]
    h = jnp.where(h > 0, h, a1 * h)                           # PReLU

    h = jnp.dot(w2t_ref[...], h,
                preferred_element_type=jnp.float32) + b2_ref[...]   # (H2, M)
    h = jnp.where(h > 0, h, a2 * h)

    h = jnp.dot(w3t_ref[...], h,
                preferred_element_type=jnp.float32) + b3_ref[...]   # (D_OUT, M)
    h = jnp.where(h > 0, h, a3 * h)

    # Softmax over the feature axis (== dim=2 of the (B, S, 5) output).
    mx = jnp.max(h, axis=0, keepdims=True)                    # (1, M)
    e = jnp.exp(h - mx)                                       # (D_OUT, M)
    inv_den = 1.0 / jnp.sum(e, axis=0, keepdims=True)         # (1, M), exact
    o_ref[...] = e * inv_den                                  # lane-dense store


def _round_up(x, m):
    return ((x + m - 1) // m) * m


def fcnn_forward(x, params, *, target_rows=8192,
                 vmem_budget_bytes=48 * 1024 * 1024):
    """Pallas forward. x: (B, S, 17) f32 -> (B, S, 5) f32 softmax probs.

    Defaults are sized for v7x (64 MiB physical VMEM).  On v5e/v6e (128 MiB)
    target_rows=16384 with vmem_budget_bytes up to ~96 MiB amortises the
    per-grid-step overhead further.
    """
    w1, b1, w2, b2, w3, b3, alphas = params
    B, S, _ = x.shape

    # --- Tile-size derivation from padded-layout VMEM accounting. ---
    s_pad = _round_up(S, 8)                  # free in-kernel flatten needs S%8==0
    rows_cap = max(1, vmem_budget_bytes // _VMEM_BYTES_PER_ROW)
    # Output blocks are (D_OUT, bt*s_pad); for multi-block grids the lane dim
    # must be a multiple of 128, so bt must be a multiple of lane_mult.
    lane_mult = 128 // math.gcd(s_pad, 128)
    if lane_mult * s_pad > rows_cap and s_pad % 128 != 0:
        # Large-S corner: padding S to a multiple of 128 makes lane_mult == 1,
        # so a single lane-aligned batch item stays as small as possible.
        s_pad = _round_up(s_pad, 128)
        lane_mult = 1
    if s_pad > rows_cap:
        # TODO(synk): tile along S with a two-pass norm (norms span all of S).
        raise ValueError(
            f"S={S} too large for one VMEM tile ({s_pad} padded rows > "
            f"{rows_cap} row budget); S-tiling not implemented.")

    bt = max(1, min(target_rows, rows_cap) // s_pad)      # rows-per-step target
    bt = min(bt, B)                                       # never exceed batch
    if B >= 2 * lane_mult:
        bt = min(bt, (B + 1) // 2)                        # >=2 steps: both v7x TCs
    bt = max(lane_mult, (bt // lane_mult) * lane_mult)    # lane-dense out blocks
    b_pad = _round_up(B, bt)
    n_blocks = b_pad // bt

    if (b_pad, s_pad) != (B, S):
        # Zero padding stays finite through normalize -> softmax and is sliced
        # off below, so it cannot contaminate valid rows.
        x = jnp.pad(x, ((0, b_pad - B), (0, s_pad - S), (0, 0)))

    # Feature-major parameter layouts (tiny, one-time).
    w1t = jnp.transpose(w1)                    # (H1, D_IN)
    w2t = jnp.transpose(w2)                    # (H2, H1)
    w3t = jnp.transpose(w3)                    # (D_OUT, H2)
    b1c = jnp.reshape(b1, (H1, 1))
    b2c = jnp.reshape(b2, (H2, 1))
    b3c = jnp.reshape(b3, (D_OUT, 1))

    out_t = pl.pallas_call(
        fcnn_kernel,
        out_shape=jax.ShapeDtypeStruct((D_OUT, b_pad * s_pad), jnp.float32),
        grid=(n_blocks,),
        in_specs=[
            pl.BlockSpec(memory_space=pltpu.MemorySpace.SMEM),       # alphas
            pl.BlockSpec((bt, s_pad, D_IN), lambda i: (i, 0, 0)),    # x
            pl.BlockSpec((H1, D_IN),        lambda i: (0, 0)),       # w1^T
            pl.BlockSpec((H1, 1),           lambda i: (0, 0)),       # b1
            pl.BlockSpec((H2, H1),          lambda i: (0, 0)),       # w2^T
            pl.BlockSpec((H2, 1),           lambda i: (0, 0)),       # b2
            pl.BlockSpec((D_OUT, H2),       lambda i: (0, 0)),       # w3^T
            pl.BlockSpec((D_OUT, 1),        lambda i: (0, 0)),       # b3
        ],
        out_specs=pl.BlockSpec((D_OUT, bt * s_pad), lambda i: (0, i)),
        compiler_params=pltpu.CompilerParams(
            # Independent batch tiles -> shard across both TCs on v7x.
            dimension_semantics=("parallel",),
            vmem_limit_bytes=vmem_budget_bytes,
        ),
    )(alphas, x, w1t, b1c, w2t, b2c, w3t, b3c)

    # Layout plumbing back to the module's (B, S, 5): one tiny 20 B/row pass.
    out = jnp.transpose(out_t.reshape(D_OUT, b_pad, s_pad), (1, 2, 0))
    return out[:B, :S]


def ref_forward(x, params):
    """Pure-JAX reference mirroring the PyTorch forward exactly."""
    w1, b1, w2, b2, w3, b3, alphas = params
    norm = jnp.sqrt(jnp.sum(x * x, axis=1, keepdims=True))
    xn = x / jnp.maximum(norm, EPS)

    def prelu(h, a):
        return jnp.where(h > 0, h, a * h)

    h = prelu(xn @ w1 + b1, alphas[0])
    h = prelu(h @ w2 + b2, alphas[1])
    h = prelu(h @ w3 + b3, alphas[2])
    return jax.nn.softmax(h, axis=2)


def init_params(key):
    ks = jax.random.split(key, 6)
    w1 = jax.random.normal(ks[0], (D_IN, H1), jnp.float32) * 0.1
    b1 = jax.random.normal(ks[1], (1, H1), jnp.float32) * 0.01
    w2 = jax.random.normal(ks[2], (H1, H2), jnp.float32) * 0.1
    b2 = jax.random.normal(ks[3], (1, H2), jnp.float32) * 0.01
    w3 = jax.random.normal(ks[4], (H2, D_OUT), jnp.float32) * 0.1
    b3 = jax.random.normal(ks[5], (1, D_OUT), jnp.float32) * 0.01
    alphas = jnp.full((3,), 0.25, jnp.float32)  # nn.PReLU() default init
    return (w1, b1, w2, b2, w3, b3, alphas)


if __name__ == "__main__":
    key = jax.random.PRNGKey(0)
    kx, kp, kx2 = jax.random.split(key, 3)

    params = init_params(kp)

    # Small demo shape consistent with the module: (batch, seq, feature=17).
    B, S = 2, 8
    x = jax.random.normal(kx, (B, S, D_IN), jnp.float32)
    out = jax.block_until_ready(fcnn_forward(x, params))
    ref = ref_forward(x, params)
    assert out.shape == (B, S, D_OUT)
    assert jnp.allclose(out, ref, atol=1e-5, rtol=1e-5)

    # Exercise multi-block grid + batch padding + S padding (S % 8 != 0).
    B2, S2 = 43, 12
    x2 = jax.random.normal(kx2, (B2, S2, D_IN), jnp.float32)
    out2 = jax.block_until_ready(fcnn_forward(x2, params, target_rows=128))
    ref2 = ref_forward(x2, params)
    assert out2.shape == (B2, S2, D_OUT)
    assert jnp.allclose(out2, ref2, atol=1e-5, rtol=1e-5)

    print("KERNEL_OK")
</pallas_src>

<mosaic_0001>
module attributes {stable_mosaic.version = 11 : i64} {
  func.func @fcnn_kernel(%arg0: i32, %arg1: memref<3xf32, #tpu.memory_space<smem>>, %arg2: memref<16x8x17xf32, #tpu.memory_space<vmem>>, %arg3: memref<32x17xf32, #tpu.memory_space<vmem>>, %arg4: memref<32x1xf32, #tpu.memory_space<vmem>>, %arg5: memref<16x32xf32, #tpu.memory_space<vmem>>, %arg6: memref<16x1xf32, #tpu.memory_space<vmem>>, %arg7: memref<5x16xf32, #tpu.memory_space<vmem>>, %arg8: memref<5x1xf32, #tpu.memory_space<vmem>>, %arg9: memref<5x128xf32, #tpu.memory_space<vmem>>) attributes {dimension_semantics = [#tpu.dimension_semantics<parallel>], iteration_bounds = array<i64: 1>, scalar_prefetch = 0 : i64, scratch_operands = 0 : i64, tpu.core_type = #tpu.core_type<tc>, window_params = [{transform_indices = @transform_0, window_bounds = array<i64: 3>}, {transform_indices = @transform_1, window_bounds = array<i64: 16, 8, 17>}, {pipeline_mode = #tpu.pipeline_mode<synchronous>, transform_indices = @transform_2, window_bounds = array<i64: 32, 17>}, {pipeline_mode = #tpu.pipeline_mode<synchronous>, transform_indices = @transform_3, window_bounds = array<i64: 32, 1>}, {pipeline_mode = #tpu.pipeline_mode<synchronous>, transform_indices = @transform_4, window_bounds = array<i64: 16, 32>}, {pipeline_mode = #tpu.pipeline_mode<synchronous>, transform_indices = @transform_5, window_bounds = array<i64: 16, 1>}, {pipeline_mode = #tpu.pipeline_mode<synchronous>, transform_indices = @transform_6, window_bounds = array<i64: 5, 16>}, {pipeline_mode = #tpu.pipeline_mode<synchronous>, transform_indices = @transform_7, window_bounds = array<i64: 5, 1>}, {transform_indices = @transform_8, window_bounds = array<i64: 5, 128>}]} {
    %c0 = arith.constant 0 : index
    %c0_0 = arith.constant 0 : index
    %c0_1 = arith.constant 0 : index
    %0 = vector.load %arg2[%c0, %c0_0, %c0_1] : memref<16x8x17xf32, #tpu.memory_space<vmem>>, vector<16x8x17xf32>
    %1 = arith.mulf %0, %0 : vector<16x8x17xf32>
    %cst = arith.constant dense<0.000000e+00> : vector<16x17xf32>
    %2 = vector.multi_reduction <add>, %1, %cst [1] : vector<16x8x17xf32> to vector<16x17xf32>
    %3 = vector.shape_cast %2 : vector<16x17xf32> to vector<16x1x17xf32>
    %4 = math.sqrt %3 : vector<16x1x17xf32>
    %cst_2 = arith.constant 9.99999996E-13 : f32
    %5 = vector.broadcast %cst_2 : f32 to vector<16x1x17xf32>
    %6 = arith.maximumf %4, %5 : vector<16x1x17xf32>
    %cst_3 = arith.constant 1.000000e+00 : f32
    %7 = vector.broadcast %cst_3 : f32 to vector<16x1x17xf32>
    %8 = arith.divf %7, %6 : vector<16x1x17xf32>
    %9 = vector.broadcast %8 : vector<16x1x17xf32> to vector<16x8x17xf32>
    %10 = arith.mulf %0, %9 : vector<16x8x17xf32>
    %11 = vector.shape_cast %10 : vector<16x8x17xf32> to vector<128x17xf32>
    %c0_4 = arith.constant 0 : index
    %12 = memref.load %arg1[%c0_4] : memref<3xf32, #tpu.memory_space<smem>>
    %c1 = arith.constant 1 : index
    %13 = memref.load %arg1[%c1] : memref<3xf32, #tpu.memory_space<smem>>
    %c2 = arith.constant 2 : index
    %14 = memref.load %arg1[%c2] : memref<3xf32, #tpu.memory_space<smem>>
    %c0_5 = arith.constant 0 : index
    %c0_6 = arith.constant 0 : index
    %15 = vector.load %arg3[%c0_5, %c0_6] : memref<32x17xf32, #tpu.memory_space<vmem>>, vector<32x17xf32>
    %cst_7 = arith.constant dense<0.000000e+00> : vector<32x128xf32>
    %16 = tpu.matmul %15, %11, %cst_7 {dimension_numbers = #tpu.dot_dimension_numbers<[1], [1], [0], [0], [0, 0, 1, 0], [], []>} : vector<32x17xf32>, vector<128x17xf32>, vector<32x128xf32> -> vector<32x128xf32>
    %c0_8 = arith.constant 0 : index
    %c0_9 = arith.constant 0 : index
    %17 = vector.load %arg4[%c0_8, %c0_9] : memref<32x1xf32, #tpu.memory_space<vmem>>, vector<32x1xf32>
    %18 = vector.broadcast %17 : vector<32x1xf32> to vector<32x128xf32>
    %19 = arith.addf %16, %18 : vector<32x128xf32>
    %cst_10 = arith.constant 0.000000e+00 : f32
    %20 = vector.broadcast %cst_10 : f32 to vector<32x128xf32>
    %21 = arith.cmpf ogt, %19, %20 : vector<32x128xf32>
    %22 = vector.broadcast %12 : f32 to vector<32x128xf32>
    %23 = arith.mulf %22, %19 : vector<32x128xf32>
    %24 = arith.select %21, %19, %23 : vector<32x128xi1>, vector<32x128xf32>
    %c0_11 = arith.constant 0 : index
    %c0_12 = arith.constant 0 : index
    %25 = vector.load %arg5[%c0_11, %c0_12] : memref<16x32xf32, #tpu.memory_space<vmem>>, vector<16x32xf32>
    %cst_13 = arith.constant dense<0.000000e+00> : vector<16x128xf32>
    %26 = tpu.matmul %25, %24, %cst_13 {dimension_numbers = #tpu.dot_dimension_numbers<[1], [0], [0], [1], [0, 0, 1, 1], [], []>} : vector<16x32xf32>, vector<32x128xf32>, vector<16x128xf32> -> vector<16x128xf32>
    %c0_14 = arith.constant 0 : index
    %c0_15 = arith.constant 0 : index
    %27 = vector.load %arg6[%c0_14, %c0_15] : memref<16x1xf32, #tpu.memory_space<vmem>>, vector<16x1xf32>
    %28 = vector.broadcast %27 : vector<16x1xf32> to vector<16x128xf32>
    %29 = arith.addf %26, %28 : vector<16x128xf32>
    %cst_16 = arith.constant 0.000000e+00 : f32
    %30 = vector.broadcast %cst_16 : f32 to vector<16x128xf32>
    %31 = arith.cmpf ogt, %29, %30 : vector<16x128xf32>
    %32 = vector.broadcast %13 : f32 to vector<16x128xf32>
    %33 = arith.mulf %32, %29 : vector<16x128xf32>
    %34 = arith.select %31, %29, %33 : vector<16x128xi1>, vector<16x128xf32>
    %c0_17 = arith.constant 0 : index
    %c0_18 = arith.constant 0 : index
    %35 = vector.load %arg7[%c0_17, %c0_18] : memref<5x16xf32, #tpu.memory_space<vmem>>, vector<5x16xf32>
    %cst_19 = arith.constant dense<0.000000e+00> : vector<5x128xf32>
    %36 = tpu.matmul %35, %34, %cst_19 {dimension_numbers = #tpu.dot_dimension_numbers<[1], [0], [0], [1], [0, 0, 1, 1], [], []>} : vector<5x16xf32>, vector<16x128xf32>, vector<5x128xf32> -> vector<5x128xf32>
    %c0_20 = arith.constant 0 : index
    %c0_21 = arith.constant 0 : index
    %37 = vector.load %arg8[%c0_20, %c0_21] : memref<5x1xf32, #tpu.memory_space<vmem>>, vector<5x1xf32>
    %38 = vector.broadcast %37 : vector<5x1xf32> to vector<5x128xf32>
    %39 = arith.addf %36, %38 : vector<5x128xf32>
    %cst_22 = arith.constant 0.000000e+00 : f32
    %40 = vector.broadcast %cst_22 : f32 to vector<5x128xf32>
    %41 = arith.cmpf ogt, %39, %40 : vector<5x128xf32>
    %42 = vector.broadcast %14 : f32 to vector<5x128xf32>
    %43 = arith.mulf %42, %39 : vector<5x128xf32>
    %44 = arith.select %41, %39, %43 : vector<5x128xi1>, vector<5x128xf32>
    %cst_23 = arith.constant dense<0xFF800000> : vector<128xf32>
    %45 = vector.multi_reduction <maximumf>, %44, %cst_23 [0] : vector<5x128xf32> to vector<128xf32>
    %46 = vector.shape_cast %45 : vector<128xf32> to vector<1x128xf32>
    %47 = vector.broadcast %46 : vector<1x128xf32> to vector<5x128xf32>
    %48 = arith.subf %44, %47 : vector<5x128xf32>
    %49 = math.exp %48 : vector<5x128xf32>
    %cst_24 = arith.constant dense<0.000000e+00> : vector<128xf32>
    %50 = vector.multi_reduction <add>, %49, %cst_24 [0] : vector<5x128xf32> to vector<128xf32>
    %51 = vector.shape_cast %50 : vector<128xf32> to vector<1x128xf32>
    %cst_25 = arith.constant 1.000000e+00 : f32
    %52 = vector.broadcast %cst_25 : f32 to vector<1x128xf32>
    %53 = arith.divf %52, %51 : vector<1x128xf32>
    %54 = vector.broadcast %53 : vector<1x128xf32> to vector<5x128xf32>
    %55 = arith.mulf %49, %54 : vector<5x128xf32>
    %c0_26 = arith.constant 0 : index
    %c0_27 = arith.constant 0 : index
    %56 = vector.load %arg9[%c0_26, %c0_27] : memref<5x128xf32, #tpu.memory_space<vmem>>, vector<5x128xf32>
    tpu.vector_store %arg9[%c0_26, %c0_27], %55 {strides = array<i32>} : memref<5x128xf32, #tpu.memory_space<vmem>>, vector<5x128xf32>,
    return
  }
  func.func @transform_0(%arg0: i32) -> i32 {
    %c0_i32 = arith.constant 0 : i32
    %c0_i32_0 = arith.constant 0 : i32
    return %c0_i32 : i32
  }
  func.func @transform_1(%arg0: i32) -> (i32, i32, i32) {
    %c0_i32 = arith.constant 0 : i32
    %c0_i32_0 = arith.constant 0 : i32
    %c0_i32_1 = arith.constant 0 : i32
    return %arg0, %c0_i32, %c0_i32_0 : i32, i32, i32
  }
  func.func @transform_2(%arg0: i32) -> (i32, i32) {
    %c0_i32 = arith.constant 0 : i32
    %c0_i32_0 = arith.constant 0 : i32
    %c0_i32_1 = arith.constant 0 : i32
    return %c0_i32, %c0_i32_0 : i32, i32
  }
  func.func @transform_3(%arg0: i32) -> (i32, i32) {
    %c0_i32 = arith.constant 0 : i32
    %c0_i32_0 = arith.constant 0 : i32
    %c0_i32_1 = arith.constant 0 : i32
    return %c0_i32, %c0_i32_0 : i32, i32
  }
  func.func @transform_4(%arg0: i32) -> (i32, i32) {
    %c0_i32 = arith.constant 0 : i32
    %c0_i32_0 = arith.constant 0 : i32
    %c0_i32_1 = arith.constant 0 : i32
    return %c0_i32, %c0_i32_0 : i32, i32
  }
  func.func @transform_5(%arg0: i32) -> (i32, i32) {
    %c0_i32 = arith.constant 0 : i32
    %c0_i32_0 = arith.constant 0 : i32
    %c0_i32_1 = arith.constant 0 : i32
    return %c0_i32, %c0_i32_0 : i32, i32
  }
  func.func @transform_6(%arg0: i32) -> (i32, i32) {
    %c0_i32 = arith.constant 0 : i32
    %c0_i32_0 = arith.constant 0 : i32
    %c0_i32_1 = arith.constant 0 : i32
    return %c0_i32, %c0_i32_0 : i32, i32
  }
  func.func @transform_7(%arg0: i32) -> (i32, i32) {
    %c0_i32 = arith.constant 0 : i32
    %c0_i32_0 = arith.constant 0 : i32
    %c0_i32_1 = arith.constant 0 : i32
    return %c0_i32, %c0_i32_0 : i32, i32
  }
  func.func @transform_8(%arg0: i32) -> (i32, i32) {
    %c0_i32 = arith.constant 0 : i32
    %c0_i32_0 = arith.constant 0 : i32
    return %c0_i32, %arg0 : i32, i32
  }
}

</mosaic_0001>

<bundles_post_ra>
// kernel: tpu_custom_call.1
= control target key start
LH: loop header
LB: loop body
LE: loop exit
PB: predicated region body
PF: predicated region fallthrough
CT: control target
= control target key end

     0   :  { %13 = vsyncpa [#allocation5], 0  ;;  %s1492_s0 = inlined_call_operand.vmem [shape: f32[3], index: 0, kind: input, shape index: {}]   ;;  %s1493_s1 = inlined_call_operand.hbm [shape: f32[16,8,17], index: 1, kind: input, shape index: {}]   ;;  %s1494_s2 = inlined_call_operand.vmem [shape: f32[32,17], index: 2, kind: input, shape index: {}]   ;;  %s1495_s3 = inlined_call_operand.vmem [shape: f32[32,1], index: 3, kind: input, shape index: {}]   ;;  %s1496_s4 = inlined_call_operand.vmem [shape: f32[16,32], index: 4, kind: input, shape index: {}]   ;;  %s1497_s5 = inlined_call_operand.vmem [shape: f32[16,1], index: 5, kind: input, shape index: {}]   ;;  %s1498_s6 = inlined_call_operand.vmem [shape: f32[5,16], index: 6, kind: input, shape index: {}]   ;;  %s1499_s7 = inlined_call_operand.vmem [shape: f32[5,1], index: 7, kind: input, shape index: {}]   ;;  %s1500_s8 = inlined_call_operand.hbm [shape: f32[5,128], index: 8, kind: output, shape index: {}]  }
   0x1   :  { %14 = vsyncpa [#allocation3], 0 }
   0x2   :  { %15 = vsyncpa [#allocation4], 0  ;;  %s22_s29 = sshll.u32 %s1492_s0, 4  ;;  %s23_s29 = int_to_ptr.vmem [resolvable:$true] %s22_s29 }
   0x3   :  { %s1041_s30 = scalar_lea.vmem %s23_s29, 16  ;;  %p1046_p1 = scmp.lt.s32.totalorder %s23_s29, %s23_s29 }
   0x4   :  { %p1042_p0 = scmp.ne.s32.totalorder %s23_s29, %s1041_s30  ;;  %p1047_p2 = scmp.lt.s32.totalorder %s1041_s30, %s1041_s30 }
   0x6   :  { %p1048_p3 = por %p1047_p2, %p1046_p1 }
   0x8   :  { %p1049_p4 = pnand %p1048_p3, %p1042_p0 }
   0xa   :  { %1052 = shalt.err (!%p1049_p4)
}
   0xb   :  { %s1103_s9 = smov [#allocation2]   ;;  %s1104_s10 = smov [#allocation6]  }
   0xc   :  { %25 = dma.vmem_to_smem %s23_s29, 16, %s1103_s9, [#allocation5]  }
   0xd   :  { %s31_s11 = sshll.u32 %s1104_s10, 4  ;;  %s1053_s14 = scalar_lea.hbm %s1493_s1, 2048  ;;  %s32_s11 = int_to_ptr.vmem [resolvable:$true] %s31_s11 }
   0xe   :  { %p1054_p5 = scmp.ne.s32.totalorder %s1493_s1, %s1053_s14  ;;  %p1057_p6 = scmp.lt.u32.totalorder %s1053_s14, %s1493_s1 }
  0x10   :  { %p1059_p7 = pnand %p1057_p6, %p1054_p5 }
  0x12   :  { %1062 = shalt.err (!%p1059_p7)
}
  0x13   :  { %s1063_s18 = scalar_lea.vmem %s32_s11, 2048  ;;  %p1068_p9 = scmp.lt.s32.totalorder %s32_s11, %s32_s11 }
  0x14   :  { %p1064_p8 = scmp.ne.s32.totalorder %s32_s11, %s1063_s18  ;;  %p1069_p10 = scmp.lt.s32.totalorder %s1063_s18, %s1063_s18 }
  0x16   :  { %p1070_p11 = por %p1069_p10, %p1068_p9 }
  0x18   :  { %p1071_p12 = pnand %p1070_p11, %p1064_p8 }
  0x1a   :  { %1074 = shalt.err (!%p1071_p12)
}
  0x1b   :  { %s1105_s19 = smov 128   ;;  %s1106_s20 = smov 8  }
  0x1c   :  { %37 = dma.hbm_to_vmem [thread:$0]  %s1493_s1, 2048, %s32_s11, [#allocation3], %s1105_s19, %s1105_s19, %s1106_s20  }
  0x1d   :  { %1097 = dma.done.wait [#allocation5], 16  }
  0x1e   :  { %1098 = vsyncadd [#allocation5], 4294967280 }
  0x1f   :  { %1099 = dma.done.wait [#allocation3], 2048  }
  0x20   :  { %1100 = vsyncadd [#allocation3], 4294965248 }
  0x21   :  { %56 = sfence }
  0x22   :  { %v1172_v0 = vld [vmem:[#allocation6] sm:$0xff]  ;;  %v1174_v1 = vld [vmem:[#allocation6 + $0x8] sm:$0xff]  ;;  %vm89_vm0 = vcmask 138240   ;;  %v1176_v2 = vld [vmem:[#allocation6 + $0x10] sm:$0xff]  ;;  %v1107_v8 = vmov 0   ;;  %s378_s20 = sld [smem:[#allocation2]] }
  0x23   :  { %v73_v3 = vmul.f32 %v1172_v0, %v1172_v0  ;;  %v74_v4 = vmul.f32 %v1174_v1, %v1174_v1  ;;  %v1182_v5 = vld [vmem:[#allocation6 + $0x18] sm:$0xff]  ;;  %v75_v6 = vmul.f32 %v1176_v2, %v1176_v2  ;;  %v1186_v7 = vld [vmem:[#allocation6 + $0x20] sm:$0xff]  ;;  %971 = vset.pattern.permute.xlu0 %v1107_v8  ;;  %972 = vset.pattern.permute.xlu1 %v1107_v8  ;;  %v1190_v10 = vld [vmem:[#allocation6 + $0x28] sm:$0xff]  ;;  %s793_s22 = sld [smem:[#allocation2 + $0x1]]  ;;  %s794_s23 = sld [smem:[#allocation2 + $0x2]] }
  0x24   :  { %v76_v9 = vmul.f32 %v1182_v5, %v1182_v5  ;;  %v77_v11 = vmul.f32 %v1186_v7, %v1186_v7  ;;  %v1194_v12 = vld [vmem:[#allocation6 + $0x30] sm:$0xff]  ;;  %v78_v16 = vmul.f32 %v1190_v10, %v1190_v10  ;;  %v1202_v21 = vld [vmem:[#allocation6 + $0x38] sm:$0xff]  ;;  %v381_v30 = vld [vmem:[%s1494_s2] sm:$0xff] }
  0x25   :  { %v90_v13 = vsel %vm89_vm0, %v73_v3, 0.0  ;;  %v97_v14 = vsel %vm89_vm0, %v74_v4, 0.0  ;;  %v104_v15 = vsel %vm89_vm0, %v75_v6, 0.0  ;;  %v79_v25 = vmul.f32 %v1194_v12, %v1194_v12  ;;  %879 = vmatprep.mubr.msk.f32.mxu0 %vm89_vm0, %v381_v30  ;;  %v385_v35 = vld [vmem:[%s1495_s3] sm:$0xff]  ;;  %v387_v40 = vld [vmem:[%s1495_s3 + $0x10] sm:$0xff]  ;;  %v386_v45 = vld [vmem:[%s1495_s3 + $0x8] sm:$0xff] }
  0x26   :  { %v91_v17 = vrot.slane %v90_v13, 4  ;;  %v98_v18 = vrot.slane %v97_v14, 4  ;;  %v105_v19 = vrot.slane %v104_v15, 4  ;;  %v111_v20 = vsel %vm89_vm0, %v76_v9, 0.0  ;;  %391 = vperm.xlu0 %971, %v385_v35   ;;  %401 = vperm.xlu1 %972, %v387_v40   ;;  %v388_v50 = vld [vmem:[%s1495_s3 + $0x18] sm:$0xff]  ;;  %v569_v63 = vld [vmem:[%s1497_s5] sm:$0xff] }
  0x27   :  { %v112_v22 = vrot.slane %v111_v20, 4  ;;  %v118_v23 = vsel %vm89_vm0, %v77_v11, 0.0  ;;  %v125_v24 = vsel %vm89_vm0, %v78_v16, 0.0  ;;  %v80_v33 = vmul.f32 %v1202_v21, %v1202_v21  ;;  %v570_v8 = vld [vmem:[%s1497_s5 + $0x8] sm:$0xff]  ;;  %v671_v16 = vld [vmem:[%s1499_s7] sm:$0x1f] }
  0x28   :  { %v92_v26 = vadd.f32 %v91_v17, %v90_v13  ;;  %v99_v27 = vadd.f32 %v98_v18, %v97_v14  ;;  %v106_v28 = vadd.f32 %v105_v19, %v104_v15  ;;  %v119_v29 = vrot.slane %v118_v23, 4  ;;  %v1249_v17 = vld [vmem:[#allocation6 + $0x40] sm:$0xff]  ;;  %v1251_v18 = vld [vmem:[#allocation6 + $0x48] sm:$0xff] }
  0x29   :  { %v113_v31 = vadd.f32 %v112_v22, %v111_v20  ;;  %v126_v32 = vrot.slane %v125_v24, 4  ;;  %v132_v34 = vsel %vm89_vm0, %v79_v25, 0.0  ;;  %v139_v44 = vsel %vm89_vm0, %v80_v33, 0.0 }
  0x2a   :  { %v93_v36 = vrot.slane %v92_v26, 2  ;;  %v100_v37 = vrot.slane %v99_v27, 2  ;;  %v107_v38 = vrot.slane %v106_v28, 2  ;;  %v120_v39 = vadd.f32 %v119_v29, %v118_v23  ;;  %396 = vperm.xlu0 %971, %v386_v45   ;;  %406 = vperm.xlu1 %972, %v388_v50  }
  0x2b   :  { %v114_v41 = vrot.slane %v113_v31, 2  ;;  %v127_v42 = vadd.f32 %v126_v32, %v125_v24  ;;  %v133_v43 = vrot.slane %v132_v34, 4  ;;  %v140_v54 = vrot.slane %v139_v44, 4 }
  0x2c   :  { %v94_v46 = vadd.f32 %v93_v36, %v92_v26  ;;  %v101_v47 = vadd.f32 %v100_v37, %v99_v27  ;;  %v108_v48 = vadd.f32 %v107_v38, %v106_v28  ;;  %v121_v49 = vrot.slane %v120_v39, 2  ;;  %v1263_v26 = vld [vmem:[#allocation6 + $0x50] sm:$0xff]  ;;  %v1265_v27 = vld [vmem:[#allocation6 + $0x58] sm:$0xff] }
  0x2d   :  { %v115_v51 = vadd.f32 %v114_v41, %v113_v31  ;;  %v128_v52 = vrot.slane %v127_v42, 2  ;;  %v134_v53 = vadd.f32 %v133_v43, %v132_v34  ;;  %v141_v62 = vadd.f32 %v140_v54, %v139_v44 }
  0x2e   :  { %v95_v55 = vrot.slane %v94_v46, 1  ;;  %v102_v56 = vrot.slane %v101_v47, 1  ;;  %v109_v57 = vrot.slane %v108_v48, 1  ;;  %v122_v58 = vadd.f32 %v121_v49, %v120_v39  ;;  %573 = vperm.xlu0 %971, %v569_v63   ;;  %578 = vperm.xlu1 %972, %v570_v8  }
  0x2f   :  { %v116_v59 = vrot.slane %v115_v51, 1  ;;  %v129_v60 = vadd.f32 %v128_v52, %v127_v42  ;;  %v135_v61 = vrot.slane %v134_v53, 2  ;;  %v142_v15 = vrot.slane %v141_v62, 2 }
  0x30   :  { %v1231_v3 = vadd.f32 %v95_v55, %v94_v46  ;;  %v1233_v4 = vadd.f32 %v102_v56, %v101_v47  ;;  %v1235_v6 = vadd.f32 %v109_v57, %v108_v48  ;;  %v123_v11 = vrot.slane %v122_v58, 1 }
  0x31   :  { %v1240_v9 = vadd.f32 %v116_v59, %v115_v51  ;;  %v130_v13 = vrot.slane %v129_v60, 1  ;;  %v136_v14 = vadd.f32 %v135_v61, %v134_v53  ;;  %v143_v25 = vadd.f32 %v142_v15, %v141_v62 }
  0x32   :  { %973 = vrsqrt.f32 %v1231_v3  ;;  %vm204_vm1 = vcmp.eq.f32.partialorder %v1231_v3, inf  ;;  %vm206_vm2 = vcmp.eq.f32.partialorder %v1231_v3, 0.0  ;;  %v207_v19 = vand.u32 2147483648, %v1231_v3  ;;  %674 = vperm.xlu0 %971, %v671_v16  }
  0x33   :  { %975 = vrsqrt.f32 %v1233_v4  ;;  %vm211_vm3 = vcmp.eq.f32.partialorder %v1233_v4, inf  ;;  %v214_v20 = vand.u32 2147483648, %v1233_v4  ;;  %vm213_vm4 = vcmp.eq.f32.partialorder %v1233_v4, 0.0 }
  0x34   :  { %977 = vrsqrt.f32 %v1235_v6  ;;  %v1259_v22 = vadd.f32 %v123_v11, %v122_v58  ;;  %v1261_v23 = vadd.f32 %v130_v13, %v129_v60  ;;  %v137_v24 = vrot.slane %v136_v14, 1 }
  0x35   :  { %979 = vrsqrt.f32 %v1240_v9  ;;  %vm218_vm5 = vcmp.eq.f32.partialorder %v1235_v6, inf  ;;  %vm220_vm6 = vcmp.eq.f32.partialorder %v1235_v6, 0.0  ;;  %v81_v28 = vmul.f32 %v1249_v17, %v1249_v17 }
  0x36   :  { %v82_v29 = vmul.f32 %v1251_v18, %v1251_v18  ;;  %v221_v30 = vand.u32 2147483648, %v1235_v6  ;;  %vm225_vm7 = vcmp.eq.f32.partialorder %v1240_v9, inf  ;;  %vm227_vm8 = vcmp.eq.f32.partialorder %v1240_v9, 0.0 }
  0x37   :  { %981 = vrsqrt.f32 %v1259_v22  ;;  %v228_v31 = vand.u32 2147483648, %v1240_v9  ;;  %v83_v32 = vmul.f32 %v1263_v26, %v1263_v26  ;;  %v84_v33 = vmul.f32 %v1265_v27, %v1265_v27 }
  0x38   :  { %983 = vrsqrt.f32 %v1261_v23  ;;  %vm232_vm9 = vcmp.eq.f32.partialorder %v1259_v22, inf  ;;  %v1284_v34 = vadd.f32 %v137_v24, %v136_v14  ;;  %v144_v35 = vrot.slane %v143_v25, 1 }
  0x39   :  { %v146_v36 = vsel %vm89_vm0, %v81_v28, 0.0  ;;  %v153_v37 = vsel %vm89_vm0, %v82_v29, 0.0  ;;  %vm234_vm10 = vcmp.eq.f32.partialorder %v1259_v22, 0.0  ;;  %v235_v38 = vand.u32 2147483648, %v1259_v22 }
  0x3a   :  { %vm239_vm11 = vcmp.eq.f32.partialorder %v1261_v23, inf  ;;  %v147_v39 = vrot.slane %v146_v36, 4  ;;  %v154_v40 = vrot.slane %v153_v37, 4  ;;  %vm241_vm12 = vcmp.eq.f32.partialorder %v1261_v23, 0.0 }
  0x3b   :  { %v242_v42 = vand.u32 2147483648, %v1261_v23  ;;  %v1293_v43 = vadd.f32 %v144_v35, %v143_v25  ;;  %985 = vrsqrt.f32 %v1284_v34  ;;  %v1298_v48 = vsel %vm89_vm0, %v83_v32, 0.0 }
  0x3c   :  { %v974_v41 = vpop.eup %973  ;;  %v148_v46 = vadd.f32 %v147_v39, %v146_v36  ;;  %v155_v47 = vadd.f32 %v154_v40, %v153_v37  ;;  %vm246_vm13 = vcmp.eq.f32.partialorder %v1284_v34, inf  ;;  %v1304_v51 = vsel %vm89_vm0, %v84_v33, 0.0 }
  0x3d   :  { %v976_v44 = vpop.eup %975  ;;  %v203_v45 = vmul.f32 %v974_v41, %v1231_v3  ;;  %987 = vrsqrt.f32 %v1293_v43  ;;  %vm248_vm14 = vcmp.eq.f32.partialorder %v1284_v34, 0.0  ;;  %v249_v55 = vand.u32 2147483648, %v1284_v34 }
  0x3e   :  { %v978_v49 = vpop.eup %977  ;;  %v210_v50 = vmul.f32 %v976_v44, %v1233_v4  ;;  %v149_v56 = vrot.slane %v148_v46, 2  ;;  %v156_v60 = vrot.slane %v155_v47, 2  ;;  %vm253_vm15 = vcmp.eq.f32.partialorder %v1293_v43, inf }
  0x3f   :  { %v980_v52 = vpop.eup %979  ;;  %v205_v53 = vsel %vm204_vm1, %v1231_v3, %v203_v45  ;;  %v217_v54 = vmul.f32 %v978_v49, %v1235_v6  ;;  %v256_v41 = vand.u32 2147483648, %v1293_v43  ;;  %vm255_vm1 = vcmp.eq.f32.partialorder %v1293_v43, 0.0  ;;  %v1361_v45 = vld [vmem:[#allocation6 + $0x68] sm:$0xff] }
  0x40   :  { %v208_v57 = vsel %vm206_vm2, %v207_v19, %v205_v53  ;;  %v212_v58 = vsel %vm211_vm3, %v1233_v4, %v210_v50  ;;  %v224_v59 = vmul.f32 %v980_v52, %v1240_v9  ;;  %v150_v8 = vadd.f32 %v149_v56, %v148_v46  ;;  %v1363_v46 = vld [vmem:[#allocation6 + $0x70] sm:$0xff] }
  0x41   :  { %v215_v61 = vsel %vm213_vm4, %v214_v20, %v212_v58  ;;  %v314_v62 = vmax.f32 %v208_v57, 1e-12  ;;  %v219_v63 = vsel %vm218_vm5, %v1235_v6, %v217_v54  ;;  %v982_v11 = vpop.eup %981  ;;  %v157_v15 = vadd.f32 %v156_v60, %v155_v47  ;;  %vm1386_vm4 = vmpackc.low %vm89_vm0, %vm89_vm0 }
  0x42   :  { %v315_v13 = vmax.f32 %v215_v61, 1e-12  ;;  %v222_v3 = vsel %vm220_vm6, %v221_v30, %v219_v63  ;;  %v226_v14 = vsel %vm225_vm7, %v1240_v9, %v224_v59  ;;  %v984_v16 = vpop.eup %983  ;;  %v231_v20 = vmul.f32 %v982_v11, %v1259_v22 }
  0x43   :  { %989 = vrcp.f32 %v314_v62  ;;  %v229_v4 = vsel %vm227_vm8, %v228_v31, %v226_v14  ;;  %v316_v19 = vmax.f32 %v222_v3, 1e-12  ;;  %v238_v25 = vmul.f32 %v984_v16, %v1261_v23  ;;  %v567_v3 = vld [vmem:[%s1496_s4] sm:$0xff] }
  0x44   :  { %991 = vrcp.f32 %v315_v13  ;;  %v317_v24 = vmax.f32 %v229_v4, 1e-12  ;;  %v151_v28 = vrot.slane %v150_v8, 1  ;;  %v233_v6 = vsel %vm232_vm9, %v1259_v22, %v231_v20 }
  0x45   :  { %993 = vrcp.f32 %v316_v19  ;;  %v158_v29 = vrot.slane %v157_v15, 1  ;;  %v986_v30 = vpop.eup %985  ;;  %v236_v9 = vsel %vm234_vm10, %v235_v38, %v233_v6  ;;  %v240_v31 = vsel %vm239_vm11, %v1261_v23, %v238_v25 }
  0x46   :  { %995 = vrcp.f32 %v317_v24  ;;  %v1341_v32 = vadd.f32 %v151_v28, %v150_v8  ;;  %v243_v33 = vsel %vm241_vm12, %v242_v42, %v240_v31  ;;  %v318_v35 = vmax.f32 %v236_v9, 1e-12  ;;  %v1356_v42 = vld [vmem:[#allocation6 + $0x60] sm:$0xff] }
  0x47   :  { %v245_v36 = vmul.f32 %v986_v30, %v1284_v34  ;;  %v1346_v37 = vadd.f32 %v158_v29, %v157_v15  ;;  %v988_v39 = vpop.eup %987  ;;  %v319_v40 = vmax.f32 %v243_v33, 1e-12  ;;  %v161_v22 = vrot.slane %v1298_v48, 4 }
  0x48   :  { %997 = vrsqrt.f32 %v1341_v32  ;;  %v252_v23 = vmul.f32 %v988_v39, %v1293_v43  ;;  %vm260_vm2 = vcmp.eq.f32.partialorder %v1341_v32, inf  ;;  %vm262_vm3 = vcmp.eq.f32.partialorder %v1341_v32, 0.0 }
  0x49   :  { %999 = vrcp.f32 %v318_v35  ;;  %v247_v38 = vsel %vm246_vm13, %v1284_v34, %v245_v36  ;;  %v263_v50 = vand.u32 2147483648, %v1341_v32  ;;  %v162_v34 = vadd.f32 %v161_v22, %v1298_v48  ;;  %v1401_v36 = vld [vmem:[#allocation6 + $0x78] sm:$0xff] }
  0x4a   :  { %1001 = vrcp.f32 %v319_v40  ;;  %v250_v44 = vsel %vm248_vm14, %v249_v55, %v247_v38  ;;  %v254_v47 = vsel %vm253_vm15, %v1293_v43, %v252_v23  ;;  %v168_v53 = vrot.slane %v1304_v51, 4 }
  0x4b   :  { %v320_v49 = vmax.f32 %v250_v44, 1e-12  ;;  %1003 = vrsqrt.f32 %v1346_v37  ;;  %v257_v52 = vsel %vm255_vm1, %v256_v41, %v254_v47  ;;  %v85_v54 = vmul.f32 %v1356_v42, %v1356_v42 }
  0x4c   :  { %v321_v56 = vmax.f32 %v257_v52, 1e-12  ;;  %v86_v43 = vmul.f32 %v1361_v45, %v1361_v45  ;;  %v87_v57 = vmul.f32 %v1363_v46, %v1363_v46  ;;  %v163_v60 = vrot.slane %v162_v34, 2 }
  0x4d   :  { %v990_v55 = vpop.eup %989  ;;  %1005 = vrcp.f32 %v320_v49  ;;  %v169_v48 = vadd.f32 %v168_v53, %v1304_v51  ;;  %v174_v61 = vsel %vm89_vm0, %v85_v54, 0.0  ;;  %vm267_vm5 = vcmp.eq.f32.partialorder %v1346_v37, inf }
  0x4e   :  { %v992_v58 = vpop.eup %991  ;;  %v362_v59 = vmul.f32 %v990_v55, %v1172_v0  ;;  %1007 = vrcp.f32 %v321_v56  ;;  %v175_v8 = vrot.slane %v174_v61, 4  ;;  %v181_v11 = vsel %vm89_vm0, %v86_v43, 0.0 }
  0x4f   :  { %v994_v62 = vpop.eup %993  ;;  %v363_v63 = vmul.f32 %v992_v58, %v1174_v1  ;;  %v164_v14 = vadd.f32 %v163_v60, %v162_v34  ;;  %v170_v51 = vrot.slane %v169_v48, 2  ;;  %v182_v15 = vrot.slane %v181_v11, 4 }
  0x50   :  { %v996_v13 = vpop.eup %995  ;;  %v364_v0 = vmul.f32 %v994_v62, %v1176_v2  ;;  %v176_v1 = vadd.f32 %v175_v8, %v174_v61  ;;  %v188_v28 = vsel %vm89_vm0, %v87_v57, 0.0  ;;  %vm269_vm6 = vcmp.eq.f32.partialorder %v1346_v37, 0.0 }
  0x51   :  { %v903_v16 = vpack.c.bf16 %v363_v63, %v362_v59  ;;  %v365_v4 = vmul.f32 %v996_v13, %v1182_v5  ;;  %v165_v20 = vrot.slane %v164_v14, 1  ;;  %v171_v24 = vadd.f32 %v170_v51, %v169_v48 }
  0x52   :  { %v998_v19 = vpop.eup %997  ;;  %v183_v25 = vadd.f32 %v182_v15, %v181_v11  ;;  %v177_v30 = vrot.slane %v176_v1, 2  ;;  %v189_v9 = vrot.slane %v188_v28, 4  ;;  %v270_v5 = vand.u32 2147483648, %v1346_v37 }
  0x53   :  { %v1000_v6 = vpop.eup %999  ;;  %905 = vmatprep.subr.msk.bf16.mxu0 %vm1386_vm4, %v903_v16  ;;  %v909_v2 = vpack.c.bf16 %v365_v4, %v364_v0  ;;  %v259_v29 = vmul.f32 %v998_v19, %v1341_v32  ;;  %v166_v33 = vadd.f32 %v165_v20, %v164_v14  ;;  %v172_v35 = vrot.slane %v171_v24, 1 }
  0x54   :  { %v1002_v31 = vpop.eup %1001  ;;  %908 = vmatpush3.bf16.xpose.msk.msra.mxu0 %vm1386_vm4, %v903_v16  ;;  %v366_v40 = vmul.f32 %v1000_v6, %v1186_v7  ;;  %v178_v38 = vadd.f32 %v177_v30, %v176_v1  ;;  %v184_v34 = vrot.slane %v183_v25, 2  ;;  %v88_v7 = vmul.f32 %v1401_v36, %v1401_v36 }
  0x55   :  { %v1004_v39 = vpop.eup %1003  ;;  %911 = vmatprep.subr.msk.bf16.mxu0 %vm1386_vm4, %v909_v2  ;;  %v367_v41 = vmul.f32 %v1002_v31, %v1190_v10  ;;  %v261_v22 = vsel %vm260_vm2, %v1341_v32, %v259_v29  ;;  %v173_v47 = vadd.f32 %v172_v35, %v171_v24  ;;  %1009 = vrsqrt.f32 %v166_v33 }
  0x56   :  { %v264_v23 = vsel %vm262_vm3, %v263_v50, %v261_v22  ;;  %v266_v44 = vmul.f32 %v1004_v39, %v1346_v37  ;;  %v190_v53 = vadd.f32 %v189_v9, %v188_v28  ;;  %v179_v56 = vrot.slane %v178_v38, 1 }
  0x57   :  { %v1006_v49 = vpop.eup %1005  ;;  %v322_v52 = vmax.f32 %v264_v23, 1e-12  ;;  %1011 = vrsqrt.f32 %v173_v47  ;;  %v915_v55 = vpack.c.bf16 %v367_v41, %v366_v40  ;;  %v185_v43 = vadd.f32 %v184_v34, %v183_v25 }
  0x58   :  { %v268_v10 = vsel %vm267_vm5, %v1346_v37, %v266_v44  ;;  %v1008_v54 = vpop.eup %1007  ;;  %v191_v57 = vrot.slane %v190_v53, 2  ;;  %v195_v58 = vsel %vm89_vm0, %v88_v7, 0.0  ;;  %v180_v59 = vadd.f32 %v179_v56, %v178_v38 }
  0x59   :  { %v271_v32 = vsel %vm269_vm6, %v270_v5, %v268_v10  ;;  %1013 = vrcp.f32 %v322_v52  ;;  %v196_v60 = vrot.slane %v195_v58, 4  ;;  %v368_v48 = vmul.f32 %v1006_v49, %v1194_v12 }
  0x5a   :  { %v323_v50 = vmax.f32 %v271_v32, 1e-12  ;;  %v369_v37 = vmul.f32 %v1008_v54, %v1202_v21  ;;  %v186_v61 = vrot.slane %v185_v43, 1  ;;  %v192_v62 = vadd.f32 %v191_v57, %v190_v53 }
  0x5b   :  { %v197_v11 = vadd.f32 %v196_v60, %v195_v58  ;;  %vm274_vm7 = vcmp.eq.f32.partialorder %v166_v33, inf  ;;  %v277_v0 = vand.u32 2147483648, %v166_v33  ;;  %vm276_vm8 = vcmp.eq.f32.partialorder %v166_v33, 0.0 }
  0x5c   :  { %914 = vmatpush3.bf16.xpose.msk.msra.mxu0 %vm1386_vm4, %v909_v2  ;;  %1015 = vrcp.f32 %v323_v50  ;;  %v187_v63 = vadd.f32 %v186_v61, %v185_v43  ;;  %v193_v8 = vrot.slane %v192_v62, 1  ;;  %v921_v14 = vpack.c.bf16 %v369_v37, %v368_v48 }
  0x5d   :  { %917 = vmatprep.subr.msk.bf16.mxu0 %vm1386_vm4, %v915_v55  ;;  %1017 = vrsqrt.f32 %v180_v59  ;;  %vm281_vm9 = vcmp.eq.f32.partialorder %v173_v47, inf  ;;  %v284_v16 = vand.u32 2147483648, %v173_v47  ;;  %v198_v12 = vrot.slane %v197_v11, 2 }
  0x5e   :  { %1019 = vrsqrt.f32 %v187_v63  ;;  %v194_v4 = vadd.f32 %v193_v8, %v192_v62  ;;  %vm283_vm10 = vcmp.eq.f32.partialorder %v173_v47, 0.0  ;;  %vm288_vm11 = vcmp.eq.f32.partialorder %v180_v59, inf }
  0x5f   :  { %v1010_v13 = vpop.eup %1009  ;;  %v199_v24 = vadd.f32 %v198_v12, %v197_v11  ;;  %vm290_vm12 = vcmp.eq.f32.partialorder %v180_v59, 0.0  ;;  %vm295_vm13 = vcmp.eq.f32.partialorder %v187_v63, inf  ;;  %v298_v22 = vand.u32 2147483648, %v187_v63 }
  0x60   :  { %v273_v51 = vmul.f32 %v1010_v13, %v166_v33  ;;  %1021 = vrsqrt.f32 %v194_v4  ;;  %vm297_vm14 = vcmp.eq.f32.partialorder %v187_v63, 0.0  ;;  %vm302_vm15 = vcmp.eq.f32.partialorder %v194_v4, inf }
  0x61   :  { %v1012_v15 = vpop.eup %1011  ;;  %v200_v30 = vrot.slane %v199_v24, 1  ;;  %v305_v49 = vand.u32 2147483648, %v194_v4  ;;  %vm304_vm1 = vcmp.eq.f32.partialorder %v194_v4, 0.0 }
  0x62   :  { %v275_v21 = vsel %vm274_vm7, %v166_v33, %v273_v51  ;;  %v280_v19 = vmul.f32 %v1012_v15, %v173_v47  ;;  %v291_v33 = vand.u32 2147483648, %v180_v59 }
  0x63   :  { %v1014_v1 = vpop.eup %1013  ;;  %v278_v20 = vsel %vm276_vm8, %v277_v0, %v275_v21  ;;  %v201_v35 = vadd.f32 %v200_v30, %v199_v24  ;;  %vm1109_vm8 = vmmov 0  }
  0x64   :  { %920 = vmatpush3.bf16.xpose.msk.msra.mxu0 %vm1386_vm4, %v915_v55  ;;  %v370_v25 = vmul.f32 %v1014_v1, %v1249_v17  ;;  %v282_v28 = vsel %vm281_vm9, %v173_v47, %v280_v19  ;;  %v324_v6 = vmax.f32 %v278_v20, 1e-12 }
  0x65   :  { %923 = vmatprep.subr.msk.bf16.mxu0 %vm1386_vm4, %v921_v14  ;;  %v285_v29 = vsel %vm283_vm10, %v284_v16, %v282_v28  ;;  %vm309_vm2 = vcmp.eq.f32.partialorder %v201_v35, inf  ;;  %v312_v57 = vand.u32 2147483648, %v201_v35  ;;  %vm311_vm3 = vcmp.eq.f32.partialorder %v201_v35, 0.0 }
  0x66   :  { %v1016_v2 = vpop.eup %1015  ;;  %v325_v31 = vmax.f32 %v285_v29, 1e-12  ;;  %1023 = vrcp.f32 %v324_v6 }
  0x67   :  { %v371_v9 = vmul.f32 %v1016_v2, %v1251_v18  ;;  %v1018_v5 = vpop.eup %1017 }
  0x68   :  { %1025 = vrcp.f32 %v325_v31  ;;  %v287_v40 = vmul.f32 %v1018_v5, %v180_v59  ;;  %v1020_v41 = vpop.eup %1019 }
  0x69   :  { %v927_v39 = vpack.c.bf16 %v371_v9, %v370_v25  ;;  %1027 = vrsqrt.f32 %v201_v35  ;;  %v294_v18 = vmul.f32 %v1020_v41, %v187_v63  ;;  %v1108_v41 = vmov 0.0|0.0  }
  0x6a   :  { %v289_v17 = vsel %vm288_vm11, %v180_v59, %v287_v40  ;;  %v1022_v44 = vpop.eup %1021  ;;  %v568_v40 = vld [vmem:[%s1496_s4 + $0x8] sm:$0xff]  ;;  %vm677_vm11 = vcmask 130048  }
  0x6b   :  { %v292_v38 = vsel %vm290_vm12, %v291_v33, %v289_v17  ;;  %v296_v47 = vsel %vm295_vm13, %v187_v63, %v294_v18  ;;  %v301_v34 = vmul.f32 %v1022_v44, %v194_v4  ;;  %v1110_v17 = vmov 0.0  }
  0x6c   :  { %926 = vmatpush3.bf16.xpose.msk.msra.mxu0 %vm1386_vm4, %v921_v14  ;;  %v326_v23 = vmax.f32 %v292_v38, 1e-12  ;;  %v299_v52 = vsel %vm297_vm14, %v298_v22, %v296_v47  ;;  %v383_v14 = vld [vmem:[%s1494_s2 + $0x10] sm:$0xff]  ;;  %v665_v18 = vstv %s793_s22  ;;  %vm755_vm13 = vcmask 1044480  }
  0x6d   :  { %929 = vmatprep.subr.msk.bf16.mxu0 %vm1386_vm4, %v927_v39  ;;  %v327_v7 = vmax.f32 %v299_v52, 1e-12  ;;  %v303_v10 = vsel %vm302_vm15, %v194_v4, %v301_v34  ;;  %v558_v4 = vstv %s378_s20 }
  0x6e   :  { %1029 = vrcp.f32 %v326_v23  ;;  %v306_v55 = vsel %vm304_vm1, %v305_v49, %v303_v10 }
  0x6f   :  { %1031 = vrcp.f32 %v327_v7  ;;  %v328_v50 = vmax.f32 %v306_v55, 1e-12 }
  0x70   :  { %v1024_v53 = vpop.eup %1023 }
  0x71   :  { %v372_v54 = vmul.f32 %v1024_v53, %v1263_v26  ;;  %1033 = vrcp.f32 %v328_v50  ;;  %v752_v50 = vstv %s794_s23 }
  0x72   :  { %v1026_v32 = vpop.eup %1025 }
  0x73   :  { %v1028_v56 = vpop.eup %1027  ;;  %v373_v43 = vmul.f32 %v1026_v32, %v1265_v27 }
  0x74   :  { %932 = vmatpush3.bf16.xpose.msk.msra.mxu0 %vm1386_vm4, %v927_v39  ;;  %v308_v58 = vmul.f32 %v1028_v56, %v201_v35 }
  0x75   :  { %v933_v59 = vpack.c.bf16 %v373_v43, %v372_v54  ;;  %v670_v54 = vld [vmem:[%s1498_s6] sm:$0x1f]  ;;  %s1111_s6 = smov [#allocation7]  }
  0x76   :  { %v310_v60 = vsel %vm309_vm2, %v201_v35, %v308_v58  ;;  %s783_s24 = sshll.u32 %s1111_s6, 4  ;;  %s784_s24 = int_to_ptr.vmem [resolvable:$true] %s783_s24 }
  0x77   :  { %935 = vmatprep.subr.msk.bf16.mxu0 %vm1386_vm4, %v933_v59  ;;  %v313_v26 = vsel %vm311_vm3, %v312_v57, %v310_v60  ;;  %s1075_s25 = scalar_lea.vmem %s784_s24, 128  ;;  %p1080_p0 = scmp.lt.s32.totalorder %s784_s24, %s784_s24 }
  0x78   :  { %v1030_v48 = vpop.eup %1029  ;;  %v329_v37 = vmax.f32 %v313_v26, 1e-12  ;;  %p1076_p13 = scmp.ne.s32.totalorder %s784_s24, %s1075_s25  ;;  %p1081_p1 = scmp.lt.s32.totalorder %s1075_s25, %s1075_s25 }
  0x79   :  { %v374_v61 = vmul.f32 %v1030_v48, %v1356_v42  ;;  %v1032_v62 = vpop.eup %1031 }
  0x7a   :  { %1035 = vrcp.f32 %v329_v37  ;;  %v375_v27 = vmul.f32 %v1032_v62, %v1361_v45  ;;  %v382_v45 = vld [vmem:[%s1494_s2 + $0x8] sm:$0xff]  ;;  %p1082_p2 = por %p1081_p1, %p1080_p0 }
  0x7b   :  { %v1034_v8 = vpop.eup %1033 }
  0x7c   :  { %938 = vmatpush3.bf16.xpose.msk.msra.mxu0 %vm1386_vm4, %v933_v59  ;;  %v939_v63 = vpack.c.bf16 %v375_v27, %v374_v61  ;;  %v376_v11 = vmul.f32 %v1034_v8, %v1363_v46  ;;  %v384_v46 = vld [vmem:[%s1494_s2 + $0x18] sm:$0xff]  ;;  %p1083_p3 = pnand %p1082_p2, %p1076_p13 }
  0x7e   :  { %941 = vmatprep.subr.msk.bf16.mxu0 %vm1386_vm4, %v939_v63 }
  0x84   :  { %944 = vmatpush3.bf16.xpose.msk.msra.mxu0 %vm1386_vm4, %v939_v63  ;;  %v1036_v13 = vpop.eup %1035 }
  0x85   :  { %v377_v42 = vmul.f32 %v1036_v13, %v1401_v36 }
  0x87   :  { %v945_v0 = vpack.c.bf16 %v377_v42, %v376_v11 }
  0x89   :  { %947 = vmatprep.subr.msk.bf16.mxu0 %vm1386_vm4, %v945_v0 }
  0x8c   :  { %950 = vmatpush3.bf16.xpose.msk.msra.mxu0 %vm1386_vm4, %v945_v0  ;;  %vm581_vm4 = vcmask 261120  }
  0x8d   :  { %893 = vmatprep.mubr.msk.f32.mxu1 %vm581_vm4, %v567_v3 }
  0x93   :  { %880 = vmatmul.mubr.msk.f32.vlgmr.msra.gmra.mrb[0].mxu0 %vm89_vm0, %v382_v45 }
  0x94   :  { %882 = vmatprep.mubr.msk.f32.mxu0 %vm89_vm0, %v383_v14 }
  0x97   :  { %883 = vmatmul.mubr.msk.f32.gmra.mrb[2].mxu0 %vm89_vm0, %v384_v46 }
  0xa5   :  { %v392_v36 = vpop.permute.xlu0 %391  ;;  %v402_v51 = vpop.permute.xlu1 %401 }
  0xa9   :  { %v397_v15 = vpop.permute.xlu0 %396  ;;  %v407_v20 = vpop.permute.xlu1 %406 }
  0xad   :  { %v579_v22 = vpop.permute.xlu1 %578  ;;  %v574_v23 = vpop.permute.xlu0 %573 }
  0xb1   :  { %v675_v55 = vpop.permute.xlu0 %674 }
 0x166   :  { %v881_v16 = vpop.f32.mrb[0].mxu0 }
 0x167   :  { %v541_v12 = vadd.f32 %v881_v16, %v397_v15  ;;  %v535_v1 = vpop.f32.mrb[1].mxu0 }
 0x168   :  { %v536_v21 = vadd.f32 %v535_v1, %v392_v36 }
 0x169   :  { %v560_v19 = vmul.f32 %v558_v4, %v541_v12  ;;  %vm555_vm5 = vcmp.gt.f32.partialorder %v541_v12, 0.0 }
 0x16a   :  { %v559_v24 = vmul.f32 %v558_v4, %v536_v21  ;;  %v884_v25 = vpop.f32.mrb[2].mxu0  ;;  %vm554_vm0 = vcmp.gt.f32.partialorder %v536_v21, 0.0 }
 0x16b   :  { %v551_v28 = vadd.f32 %v884_v25, %v407_v20  ;;  %v545_v6 = vpop.f32.mrb[3].mxu0  ;;  %v564_v2 = vsel %vm555_vm5, %v541_v12, %v560_v19 }
 0x16c   :  { %v546_v29 = vadd.f32 %v545_v6, %v402_v51  ;;  %v563_v30 = vsel %vm554_vm0, %v536_v21, %v559_v24 }
 0x16d   :  { %vm557_vm6 = vcmp.gt.f32.partialorder %v551_v28, 0.0  ;;  %v562_v9 = vmul.f32 %v558_v4, %v551_v28  ;;  %v951_v31 = vpack.c.bf16 %v564_v2, %v563_v30 }
 0x16e   :  { %vm556_vm7 = vcmp.gt.f32.partialorder %v546_v29, 0.0  ;;  %v561_v5 = vmul.f32 %v558_v4, %v546_v29 }
 0x16f   :  { %952 = vmatprep.subr.bf16.mxu1 %v951_v31  ;;  %v566_v33 = vsel %vm557_vm6, %v551_v28, %v562_v9 }
 0x170   :  { %954 = vmatpush3.bf16.msra.mxu1 %v951_v31  ;;  %v565_v35 = vsel %vm556_vm7, %v546_v29, %v561_v5 }
 0x171   :  { %v955_v39 = vpack.c.bf16 %v566_v33, %v565_v35 }
 0x173   :  { %956 = vmatprep.subr.bf16.mxu1 %v955_v39 }
 0x174   :  { %958 = vmatpush3.bf16.msra.mxu1 %v955_v39 }
 0x175   :  { %959 = vmatprep.subr.bf16.mxu1 %v1108_v41 }
 0x177   :  { %894 = vmatmul.mubr.msk.f32.vlgmr.msra.gmra.mrb[0].mxu1 %vm581_vm4, %v568_v40 }
 0x178   :  { %900 = vmatprep.mubr.msk.f32.mxu1 %vm1109_vm8, %v1110_v17 }
 0x24a   :  { %v895_v38 = vpop.f32.mrb[0].mxu1 }
 0x24b   :  { %v660_v44 = vadd.f32 %v895_v38, %v579_v22  ;;  %v654_v47 = vpop.f32.mrb[1].mxu1 }
 0x24c   :  { %v655_v49 = vadd.f32 %v654_v47, %v574_v23 }
 0x24d   :  { %vm664_vm9 = vcmp.gt.f32.partialorder %v660_v44, 0.0  ;;  %v667_v52 = vmul.f32 %v665_v18, %v660_v44 }
 0x24e   :  { %vm663_vm10 = vcmp.gt.f32.partialorder %v655_v49, 0.0  ;;  %v666_v34 = vmul.f32 %v665_v18, %v655_v49 }
 0x24f   :  { %v669_v7 = vsel %vm664_vm9, %v660_v44, %v667_v52 }
 0x250   :  { %v668_v53 = vsel %vm663_vm10, %v655_v49, %v666_v34 }
 0x251   :  { %v960_v10 = vpack.c.bf16 %v669_v7, %v668_v53 }
 0x253   :  { %961 = vmatpush3.bf16.msra.mxu1 %v960_v10 }
 0x256   :  { %901 = vmatmul.mubr.msk.f32.vlgmr.msra.gmra.mrb[2].mxu1 %vm677_vm11, %v670_v54 }
 0x329   :  { %v747_v32 = vpop.f32.mrb[2].mxu1 }
 0x32a   :  { %v748_v56 = vadd.f32 %v747_v32, %v675_v55  ;;  %v902_v43 = vpop.f32.mrb[3].mxu1 }
 0x32c   :  { %vm751_vm12 = vcmp.gt.f32.partialorder %v748_v56, 0.0  ;;  %v753_v57 = vmul.f32 %v752_v50, %v748_v56 }
 0x32e   :  { %v754_v58 = vsel %vm751_vm12, %v748_v56, %v753_v57 }
 0x32f   :  { %v756_v59 = vsel %vm755_vm13, %v754_v58, -inf }
 0x330   :  { %v757_v60 = vrot.slane %v756_v59, 4 }
 0x332   :  { %v758_v26 = vmax.f32 %v756_v59, %v757_v60 }
 0x334   :  { %v759_v48 = vrot.slane %v758_v26, 2 }
 0x336   :  { %v760_v37 = vmax.f32 %v758_v26, %v759_v48 }
 0x338   :  { %v761_v61 = vrot.slane %v760_v37, 1 }
 0x33a   :  { %v762_v62 = vmax.f32 %v760_v37, %v761_v61 }
 0x33c   :  { %v763_v27 = vsub.f32 %v754_v58, %v762_v62 }
 0x33e   :  { %v764_v63 = vmul.f32 1.442695, %v763_v27 }
 0x340   :  { %1037 = vpow2.f32 %v764_v63 }
 0x34a   :  { %v1038_v8 = vpop.eup %1037 }
 0x34b   :  { %v766_v11 = vsel %vm755_vm13, %v1038_v8, 0.0 }
 0x34c   :  { %v767_v13 = vrot.slane %v766_v11, 4 }
 0x34e   :  { %v768_v42 = vadd.f32 %v767_v13, %v766_v11 }
 0x350   :  { %v769_v0 = vrot.slane %v768_v42, 2 }
 0x352   :  { %v770_v45 = vadd.f32 %v769_v0, %v768_v42 }
 0x354   :  { %v771_v14 = vrot.slane %v770_v45, 1 }
 0x356   :  { %v772_v46 = vadd.f32 %v771_v14, %v770_v45 }
 0x358   :  { %1039 = vrcp.f32 %v772_v46 }
 0x362   :  { %v1040_v3 = vpop.eup %1039 }
 0x363   :  { %v775_v36 = vmul.f32 %v1040_v3, %v1038_v8 }
 0x365   :  { %776 = vst [vmem:[#allocation7] sm:$0x1f] %v775_v36 }
 0x366   :  { %1086 = shalt.err (!%p1083_p3)
}
 0x367   :  { %s1087_s28 = scalar_lea.hbm %s1500_s8, 128 }
 0x368   :  { %p1088_p4 = scmp.ne.s32.totalorder %s1500_s8, %s1087_s28  ;;  %p1091_p5 = scmp.lt.u32.totalorder %s1087_s28, %s1500_s8 }
 0x36a   :  { %p1093_p6 = pnand %p1091_p5, %p1088_p4 }
 0x36c   :  { %1096 = shalt.err (!%p1093_p6)
}
 0x36d   :  { %786 = dma.vmem_to_hbm [thread:$0]  %s784_s24, 128, %s1500_s8, [#allocation4]  }
 0x36e   :  { %1101 = dma.done.wait [#allocation4], 128  }
 0x36f   :  { %1102 = vsyncadd [#allocation4], 4294967168 }
 0x370   :  { %790 = vsyncpa [#allocation3], 1 }
 0x371   :  { %791 = vsyncpa [#allocation4], 1 }
 0x372   :  { %792 = vsyncpa [#allocation5], 1 }

</bundles_post_ra>
